<compile_context>
chip_gen: v7x
topology: tpu7x:2x2x1
jax: 0.10.0
libtpu: 0.0.40
codegen_flags: <defaults>
</compile_context>

<pallas_src>
import jax
import jax.numpy as jnp
from jax import lax
from jax.experimental import pallas as pl
from jax.experimental.pallas import tpu as pltpu


def _round_up(v, m):
    return ((v + m - 1) // m) * m


def _simplenet_kernel(x_ref, w1_ref, b1_ref, w2t_ref, b2_ref, o_ref):
    """One batch tile of the SimpleNet forward, producing a lane-dense
    transposed output tile.

    x_ref  : (TB, K)            input rows (f32 or bf16)
    w1_ref : (K, H_pad)         layer-1 weight, pre-transposed (f32 or bf16)
    b1_ref : (1, H_pad)         layer-1 bias (f32)
    w2t_ref: (N_pad, H_pad)     layer-2 weight rows, zero-padded to >=8 (f32)
    b2_ref : (n_output, 1)      layer-2 bias (f32)
    o_ref  : (n_output, TB)     transposed output tile (f32), lane-dense
    """
    n_output = o_ref.shape[0]
    # Layer 1 on the MXU with f32 accumulation; bias + ReLU on the VPU.
    h = jnp.dot(x_ref[...], w1_ref[...], preferred_element_type=jnp.float32)
    h = jnp.maximum(h + b1_ref[...], 0.0)
    # Dropout with p = 0.0 is the identity.
    # Layer 2 as an "NT" matmul on the MXU (contract the hidden dim of both
    # operands), producing a lane-dense (N_pad, TB) tile directly; keep only
    # the real n_output rows for the store.
    out = lax.dot_general(
        w2t_ref[...], h, (((1,), (1,)), ((), ())),
        preferred_element_type=jnp.float32)                 # (N_pad, TB)
    o_ref[...] = (out[:n_output, :] + b2_ref[...]).astype(o_ref.dtype)


def simplenet_forward(x, w1, b1, w2, b2, *, block_batch=4096,
                      cast_inputs_to_bf16=False):
    """x: [B, input_size]; w1: [input_size, n_hidden]; b1: [n_hidden];
       w2: [n_hidden, n_output]; b2: [n_output]  ->  [B, n_output]."""
    x = jnp.asarray(x, jnp.float32)
    B, K = x.shape
    Kw, H = w1.shape
    assert Kw == K, "w1 must be [input_size, n_hidden] (pre-transposed)"
    n_output = w2.shape[-1]

    w1 = jnp.asarray(w1, jnp.float32)
    w2 = jnp.asarray(w2, jnp.float32).reshape(H, n_output)
    b1 = jnp.asarray(b1, jnp.float32).reshape(1, H)
    b2 = jnp.asarray(b2, jnp.float32).reshape(n_output, 1)

    # --- Pad hidden dim to a multiple of 128 lanes (once; padded columns are
    #     zero so they contribute nothing downstream of the ReLU).
    H_pad = max(128, _round_up(H, 128))
    if H_pad != H:
        w1 = jnp.pad(w1, ((0, 0), (0, H_pad - H)))
        b1 = jnp.pad(b1, ((0, 0), (0, H_pad - H)))
        w2 = jnp.pad(w2, ((0, H_pad - H), (0, 0)))

    # --- Layer-2 weight rows, padded to >=8 sublanes for an MXU-friendly M dim
    #     (VMEM-only padding; the kernel slices the real rows before storing).
    N_pad = max(8, _round_up(n_output, 8))
    w2t = w2.T                                   # (n_output, H_pad)
    if N_pad != n_output:
        w2t = jnp.pad(w2t, ((0, N_pad - n_output), (0, 0)))

    # --- Batch tile.  Large so per-step traffic >> fixed grid-step overhead;
    #     multiple of 128 whenever the grid has >1 step (lane-dense output
    #     block divisibility).  For mid-sized B, aim for >=2 balanced steps so
    #     both v7x TensorCores get work (no-op on single-TC v5e/v6e).
    if B <= 128:
        TB = max(8, _round_up(B, 8))             # single step, full-extent tile
    else:
        TB = min(_round_up(block_batch, 128), _round_up(pl.cdiv(B, 2), 128))
    B_pad = _round_up(B, TB)
    if B_pad != B:
        x = jnp.pad(x, ((0, B_pad - B), (0, 0)))

    # Optional bf16 streaming of the bandwidth-critical operands (accumulation
    # stays f32 inside the kernel).  Off by default to preserve f32 semantics.
    if cast_inputs_to_bf16:
        x = x.astype(jnp.bfloat16)
        w1 = w1.astype(jnp.bfloat16)

    grid = (B_pad // TB,)
    in_itemsize = jnp.dtype(x.dtype).itemsize
    cost = pl.CostEstimate(
        flops=2 * B_pad * H_pad * (K + N_pad),
        transcendentals=0,
        bytes_accessed=(B_pad * K * in_itemsize + K * H_pad * in_itemsize
                        + 4 * (H_pad + N_pad * H_pad + n_output
                               + n_output * B_pad)),
    )

    out_t = pl.pallas_call(
        _simplenet_kernel,
        out_shape=jax.ShapeDtypeStruct((n_output, B_pad), jnp.float32),
        grid=grid,
        in_specs=[
            pl.BlockSpec((TB, K), lambda i: (i, 0)),          # x: batch-tiled
            pl.BlockSpec((K, H_pad), lambda i: (0, 0)),       # W1: resident
            pl.BlockSpec((1, H_pad), lambda i: (0, 0)),       # b1: resident
            pl.BlockSpec((N_pad, H_pad), lambda i: (0, 0)),   # W2^T: resident
            pl.BlockSpec((n_output, 1), lambda i: (0, 0)),    # b2: resident
        ],
        out_specs=pl.BlockSpec((n_output, TB), lambda i: (0, i)),  # lane-dense
        compiler_params=pltpu.CompilerParams(
            dimension_semantics=("parallel",)),
        cost_estimate=cost,
    )(x, w1, b1, w2t, b2)

    # Tiny transpose back to [B, n_output] in the wrapper.
    return out_t[:, :B].T


def _ref_forward(x, w1, b1, w2, b2):
    h = jnp.maximum(x @ w1 + b1.reshape(1, -1), 0.0)
    return h @ w2 + b2.reshape(1, -1)


if __name__ == "__main__":
    # Small shapes consistent with the module: input_size=32, n_hidden=32, n_output=1.
    B, input_size, n_hidden, n_output = 8, 32, 32, 1

    key = jax.random.PRNGKey(0)
    kx, kw1, kb1, kw2, kb2 = jax.random.split(key, 5)

    x = jax.random.normal(kx, (B, input_size), dtype=jnp.float32)

    # Deterministic PyTorch-style uniform(-1/sqrt(fan_in), 1/sqrt(fan_in)) init.
    bound1 = 1.0 / (input_size ** 0.5)
    w1 = jax.random.uniform(kw1, (input_size, n_hidden), jnp.float32, -bound1, bound1)
    b1 = jax.random.uniform(kb1, (n_hidden,), jnp.float32, -bound1, bound1)
    bound2 = 1.0 / (n_hidden ** 0.5)
    w2 = jax.random.uniform(kw2, (n_hidden, n_output), jnp.float32, -bound2, bound2)
    b2 = jax.random.uniform(kb2, (n_output,), jnp.float32, -bound2, bound2)

    # n_output == 1, single grid step.
    out = jax.block_until_ready(simplenet_forward(x, w1, b1, w2, b2))
    ref = _ref_forward(x, w1, b1, w2, b2.reshape(-1))
    assert out.shape == (B, n_output)
    assert jnp.allclose(out, ref, atol=1e-5, rtol=1e-5)

    # n_output > 1 path.
    n_out2 = 4
    w2b = jax.random.uniform(kw2, (n_hidden, n_out2), jnp.float32, -bound2, bound2)
    b2b = jax.random.uniform(kb2, (n_out2,), jnp.float32, -bound2, bound2)
    out2 = jax.block_until_ready(simplenet_forward(x, w1, b1, w2b, b2b))
    ref2 = _ref_forward(x, w1, b1, w2b, b2b)
    assert out2.shape == (B, n_out2)
    assert jnp.allclose(out2, ref2, atol=1e-5, rtol=1e-5)

    # Multi-step grid (>=2 blocks, lane-dense transposed output writeback).
    B3 = 300
    x3 = jax.random.normal(kx, (B3, input_size), dtype=jnp.float32)
    out3 = jax.block_until_ready(simplenet_forward(x3, w1, b1, w2, b2))
    ref3 = _ref_forward(x3, w1, b1, w2, b2.reshape(-1))
    assert out3.shape == (B3, n_output)
    assert jnp.allclose(out3, ref3, atol=1e-5, rtol=1e-5)

    # Optional bf16-streaming path (looser tolerance by construction).
    out3b = jax.block_until_ready(
        simplenet_forward(x3, w1, b1, w2, b2, cast_inputs_to_bf16=True))
    assert jnp.allclose(out3b, ref3, atol=5e-2, rtol=5e-2)

    print("KERNEL_OK")
</pallas_src>

<mosaic_0001>
module attributes {stable_mosaic.version = 11 : i64} {
  func.func @_simplenet_kernel(%arg0: i32, %arg1: memref<8x32xf32, #tpu.memory_space<vmem>>, %arg2: memref<32x128xf32, #tpu.memory_space<vmem>>, %arg3: memref<1x128xf32, #tpu.memory_space<vmem>>, %arg4: memref<8x128xf32, #tpu.memory_space<vmem>>, %arg5: memref<1x1xf32, #tpu.memory_space<vmem>>, %arg6: memref<1x8xf32, #tpu.memory_space<vmem>>) attributes {dimension_semantics = [#tpu.dimension_semantics<parallel>], iteration_bounds = array<i64: 1>, scalar_prefetch = 0 : i64, scratch_operands = 0 : i64, tpu.core_type = #tpu.core_type<tc>, window_params = [{transform_indices = @transform_0, window_bounds = array<i64: 8, 32>}, {pipeline_mode = #tpu.pipeline_mode<synchronous>, transform_indices = @transform_1, window_bounds = array<i64: 32, 128>}, {pipeline_mode = #tpu.pipeline_mode<synchronous>, transform_indices = @transform_2, window_bounds = array<i64: 1, 128>}, {pipeline_mode = #tpu.pipeline_mode<synchronous>, transform_indices = @transform_3, window_bounds = array<i64: 8, 128>}, {pipeline_mode = #tpu.pipeline_mode<synchronous>, transform_indices = @transform_4, window_bounds = array<i64: 1, 1>}, {transform_indices = @transform_5, window_bounds = array<i64: 1, 8>}]} {
    %c0 = arith.constant 0 : index
    %c0_0 = arith.constant 0 : index
    %0 = vector.load %arg1[%c0, %c0_0] : memref<8x32xf32, #tpu.memory_space<vmem>>, vector<8x32xf32>
    %c0_1 = arith.constant 0 : index
    %c0_2 = arith.constant 0 : index
    %1 = vector.load %arg2[%c0_1, %c0_2] : memref<32x128xf32, #tpu.memory_space<vmem>>, vector<32x128xf32>
    %cst = arith.constant dense<0.000000e+00> : vector<8x128xf32>
    %2 = tpu.matmul %0, %1, %cst {dimension_numbers = #tpu.dot_dimension_numbers<[1], [0], [0], [1], [0, 0, 1, 1], [], []>} : vector<8x32xf32>, vector<32x128xf32>, vector<8x128xf32> -> vector<8x128xf32>
    %c0_3 = arith.constant 0 : index
    %c0_4 = arith.constant 0 : index
    %3 = vector.load %arg3[%c0_3, %c0_4] : memref<1x128xf32, #tpu.memory_space<vmem>>, vector<1x128xf32>
    %4 = vector.broadcast %3 : vector<1x128xf32> to vector<8x128xf32>
    %5 = arith.addf %2, %4 : vector<8x128xf32>
    %cst_5 = arith.constant 0.000000e+00 : f32
    %6 = vector.broadcast %cst_5 : f32 to vector<8x128xf32>
    %7 = arith.maximumf %5, %6 : vector<8x128xf32>
    %c0_6 = arith.constant 0 : index
    %c0_7 = arith.constant 0 : index
    %8 = vector.load %arg4[%c0_6, %c0_7] : memref<8x128xf32, #tpu.memory_space<vmem>>, vector<8x128xf32>
    %cst_8 = arith.constant dense<0.000000e+00> : vector<8x8xf32>
    %9 = tpu.matmul %8, %7, %cst_8 {dimension_numbers = #tpu.dot_dimension_numbers<[1], [1], [0], [0], [0, 0, 1, 0], [], []>} : vector<8x128xf32>, vector<8x128xf32>, vector<8x8xf32> -> vector<8x8xf32>
    %10 = vector.extract_strided_slice %9 {offsets = [0, 0], sizes = [1, 8], strides = [1, 1]} : vector<8x8xf32> to vector<1x8xf32>
    %c0_9 = arith.constant 0 : index
    %c0_10 = arith.constant 0 : index
    %11 = vector.load %arg5[%c0_9, %c0_10] : memref<1x1xf32, #tpu.memory_space<vmem>>, vector<1x1xf32>
    %12 = vector.broadcast %11 : vector<1x1xf32> to vector<1x8xf32>
    %13 = arith.addf %10, %12 : vector<1x8xf32>
    %c0_11 = arith.constant 0 : index
    %c0_12 = arith.constant 0 : index
    %14 = vector.load %arg6[%c0_11, %c0_12] : memref<1x8xf32, #tpu.memory_space<vmem>>, vector<1x8xf32>
    tpu.vector_store %arg6[%c0_11, %c0_12], %13 {strides = array<i32>} : memref<1x8xf32, #tpu.memory_space<vmem>>, vector<1x8xf32>,
    return
  }
  func.func @transform_0(%arg0: i32) -> (i32, i32) {
    %c0_i32 = arith.constant 0 : i32
    %c0_i32_0 = arith.constant 0 : i32
    return %arg0, %c0_i32 : i32, i32
  }
  func.func @transform_1(%arg0: i32) -> (i32, i32) {
    %c0_i32 = arith.constant 0 : i32
    %c0_i32_0 = arith.constant 0 : i32
    %c0_i32_1 = arith.constant 0 : i32
    return %c0_i32, %c0_i32_0 : i32, i32
  }
  func.func @transform_2(%arg0: i32) -> (i32, i32) {
    %c0_i32 = arith.constant 0 : i32
    %c0_i32_0 = arith.constant 0 : i32
    %c0_i32_1 = arith.constant 0 : i32
    return %c0_i32, %c0_i32_0 : i32, i32
  }
  func.func @transform_3(%arg0: i32) -> (i32, i32) {
    %c0_i32 = arith.constant 0 : i32
    %c0_i32_0 = arith.constant 0 : i32
    %c0_i32_1 = arith.constant 0 : i32
    return %c0_i32, %c0_i32_0 : i32, i32
  }
  func.func @transform_4(%arg0: i32) -> (i32, i32) {
    %c0_i32 = arith.constant 0 : i32
    %c0_i32_0 = arith.constant 0 : i32
    %c0_i32_1 = arith.constant 0 : i32
    return %c0_i32, %c0_i32_0 : i32, i32
  }
  func.func @transform_5(%arg0: i32) -> (i32, i32) {
    %c0_i32 = arith.constant 0 : i32
    %c0_i32_0 = arith.constant 0 : i32
    return %c0_i32, %arg0 : i32, i32
  }
}

</mosaic_0001>

<bundles_post_ra>
// kernel: tpu_custom_call.1
= control target key start
LH: loop header
LB: loop body
LE: loop exit
PB: predicated region body
PF: predicated region fallthrough
CT: control target
= control target key end

     0   :  { %s440_s0 = inlined_call_operand.hbm [shape: f32[8,32], index: 0, kind: input, shape index: {}]   ;;  %s441_s1 = inlined_call_operand.hbm [shape: f32[32,128], index: 1, kind: input, shape index: {}]   ;;  %s442_s2 = inlined_call_operand.vmem [shape: f32[1,128], index: 2, kind: input, shape index: {}]   ;;  %s443_s3 = inlined_call_operand.vmem [shape: f32[8,128], index: 3, kind: input, shape index: {}]   ;;  %s444_s4 = inlined_call_operand.<no memory space> [shape: f32[1,1], index: 4, kind: input, shape index: {}]   ;;  %s445_s5 = inlined_call_operand.hbm [shape: f32[1,8], index: 5, kind: output, shape index: {}]  }
   0x1   :  { %v10_v0 = vstv %s444_s4 }
   0x2   :  { %11 = vst [vmem:[#allocation2] sm:$0x1] %v10_v0 }
   0x3   :  { %12 = vsyncpa [#allocation4], 0 }
   0x4   :  { %13 = vsyncpa [#allocation7], 0 }
   0x5   :  { %14 = vsyncpa [#allocation5], 0  ;;  %s349_s20 = smov [#allocation3]   ;;  %s350_s22 = smov [#allocation6]  }
   0x6   :  { %s21_s21 = sshll.u32 %s349_s20, 4  ;;  %s30_s23 = sshll.u32 %s350_s22, 4  ;;  %s22_s21 = int_to_ptr.vmem [resolvable:$true] %s21_s21  ;;  %s391_s23 = int_to_ptr.vmem [resolvable:$true] %s30_s23 }
   0x7   :  { %s277_s26 = scalar_lea.hbm %s440_s0, 128 }
   0x8   :  { %p278_p0 = scmp.ne.s32.totalorder %s440_s0, %s277_s26  ;;  %p281_p1 = scmp.lt.u32.totalorder %s277_s26, %s440_s0 }
   0xa   :  { %p283_p2 = pnand %p281_p1, %p278_p0 }
   0xc   :  { %286 = shalt.err (!%p283_p2)
}
   0xd   :  { %s287_s30 = scalar_lea.vmem %s22_s21, 128  ;;  %p292_p4 = scmp.lt.s32.totalorder %s22_s21, %s22_s21 }
   0xe   :  { %p288_p3 = scmp.ne.s32.totalorder %s22_s21, %s287_s30  ;;  %p293_p5 = scmp.lt.s32.totalorder %s287_s30, %s287_s30 }
  0x10   :  { %p294_p6 = por %p293_p5, %p292_p4 }
  0x12   :  { %p295_p7 = pnand %p294_p6, %p288_p3 }
  0x14   :  { %298 = shalt.err (!%p295_p7)
}
  0x15   :  { %24 = dma.hbm_to_vmem [thread:$0]  %s440_s0, 128, %s22_s21, [#allocation4]  }
  0x16   :  { %s299_s10 = scalar_lea.hbm %s441_s1, 512 }
  0x17   :  { %p300_p8 = scmp.ne.s32.totalorder %s441_s1, %s299_s10  ;;  %p303_p9 = scmp.lt.u32.totalorder %s299_s10, %s441_s1 }
  0x19   :  { %p305_p10 = pnand %p303_p9, %p300_p8 }
  0x1b   :  { %308 = shalt.err (!%p305_p10)
}
  0x1c   :  { %s309_s15 = scalar_lea.vmem %s391_s23, 512  ;;  %p314_p12 = scmp.lt.s32.totalorder %s391_s23, %s391_s23 }
  0x1d   :  { %p310_p11 = scmp.ne.s32.totalorder %s391_s23, %s309_s15  ;;  %p315_p13 = scmp.lt.s32.totalorder %s309_s15, %s309_s15 }
  0x1f   :  { %p316_p0 = por %p315_p13, %p314_p12 }
  0x21   :  { %p317_p1 = pnand %p316_p0, %p310_p11 }
  0x23   :  { %320 = shalt.err (!%p317_p1)
}
  0x24   :  { %s351_s0 = smov 128   ;;  %s352_s16 = smov 8  }
  0x25   :  { %36 = dma.hbm_to_vmem [thread:$0]  %s441_s1, 512, %s391_s23, [#allocation7], %s351_s0, %s351_s0, %s352_s16  }
  0x26   :  { %343 = dma.done.wait [#allocation4], 128  }
  0x27   :  { %344 = vsyncadd [#allocation4], 4294967168 }
  0x28   :  { %345 = dma.done.wait [#allocation7], 512  }
  0x29   :  { %346 = vsyncadd [#allocation7], 4294966784  ;;  %v353_v1 = vmov 0.0|0.0   ;;  %vm354_vm0 = vmmov 0   ;;  %v355_v2 = vmov 0.0   ;;  %v50_v3 = vld [vmem:[#allocation6] sm:$0xff]  ;;  %v213_v18 = vlaneseq }
  0x2a   :  { %261 = vmatprep.subr.bf16.mxu0 %v353_v1  ;;  %253 = vmatprep.mubr.msk.f32.mxu0 %vm354_vm0, %v355_v2  ;;  %v51_v4 = vld [vmem:[#allocation6 + $0x8] sm:$0xff]  ;;  %v52_v5 = vld [vmem:[#allocation6 + $0x10] sm:$0xff]  ;;  %v53_v7 = vld [vmem:[#allocation6 + $0x18] sm:$0xff]  ;;  %vm61_vm1 = vcmask 261120   ;;  %v356_v11 = vmov 0   ;;  %s357_s22 = smov [#allocation8]  }
  0x2b   :  { %256 = vmatprep.subr.mxu1 %v355_v2  ;;  %258 = vmatprep.mubr.msk.f32.mxu1 %vm354_vm0, %v355_v2  ;;  %v262_v6 = vpack.c.bf16 %v51_v4, %v50_v3  ;;  %v265_v8 = vpack.c.bf16 %v53_v7, %v52_v5  ;;  %v49_v9 = vld [vmem:[#allocation3] sm:$0xff]  ;;  %v207_v10 = vld [vmem:[#allocation2] sm:$0x1]  ;;  %v214_v19 = vshrl.u32 %v213_v18, 7  ;;  %s226_s23 = sshll.u32 %s357_s22, 4  ;;  %vm218_vm2 = vcmask 57344   ;;  %s227_s23 = int_to_ptr.vmem [resolvable:$true] %s226_s23 }
  0x2c   :  { %276 = vset.pattern.permute.xlu0 %v356_v11  ;;  %v236_v12 = vld [vmem:[%s442_s2] ss:$0 sm:$0xff]  ;;  %s321_s2 = scalar_lea.vmem %s227_s23, 16  ;;  %s325_s24 = scalar_lea.vmem %s227_s23, 32 }
  0x2d   :  { %263 = vmatpush3.bf16.msra.mxu0 %v262_v6  ;;  %210 = vperm.xlu0 %276, %v207_v10   ;;  %v136_v17 = vld [vmem:[%s443_s3] sm:$0xff]  ;;  %v215_v20 = vsub.s32 0, %v214_v19  ;;  %p322_p2 = scmp.ne.s32.totalorder %s227_s23, %s321_s2  ;;  %p326_p3 = scmp.lt.s32.totalorder %s227_s23, %s227_s23 }
  0x2e   :  { %264 = vmatprep.subr.bf16.mxu0 %v353_v1  ;;  %p327_p4 = scmp.lt.s32.totalorder %s325_s24, %s321_s2 }
  0x30   :  { %p328_p5 = por %p327_p4, %p326_p3 }
  0x31   :  { %266 = vmatpush3.bf16.msra.mxu0 %v265_v8 }
  0x32   :  { %p329_p6 = pnand %p328_p5, %p322_p2 }
  0x34   :  { %254 = vmatmul.mubr.msk.f32.vlgmr.msra.gmra.mrb[0].mxu0 %vm61_vm1, %v49_v9 }
  0xac   :  { %v211_v21 = vpop.permute.xlu0 %210 }
  0xad   :  { %v216_v22 = vrot.slane %v211_v21, %v215_v20 }
 0x107   :  { %v131_v13 = vpop.f32.mrb[0].mxu0 }
 0x108   :  { %v132_v14 = vadd.f32 %v236_v12, %v131_v13  ;;  %v255_v15 = vpop.f32.mrb[1].mxu0 }
 0x10a   :  { %v135_v16 = vmax.f32 %v132_v14, 0.0 }
 0x10c   :  { %257 = vmatpush3.xpose.msra.mxu1 %v135_v16 }
 0x10f   :  { %259 = vmatmul.mubr.f32.vlgmr.msra.gmra.mrb[0].mxu1 %v136_v17 }
 0x1e2   :  { %v203_v23 = vpop.f32.mrb[0].mxu1 }
 0x1e3   :  { %v217_v24 = vadd.f32 %v216_v22, %v203_v23  ;;  %v260_v25 = vpop.f32.mrb[1].mxu1 }
 0x1e5   :  { %219 = vst.msk [vmem:[#allocation8] sm:$0x1] %vm218_vm2, %v217_v24 }
 0x1e6   :  { %332 = shalt.err (!%p329_p6)
}
 0x1e7   :  { %s333_s26 = scalar_lea.hbm %s445_s5, 16 }
 0x1e8   :  { %p334_p7 = scmp.ne.s32.totalorder %s445_s5, %s333_s26  ;;  %p337_p8 = scmp.lt.u32.totalorder %s333_s26, %s445_s5 }
 0x1ea   :  { %p339_p9 = pnand %p337_p8, %p334_p7 }
 0x1ec   :  { %342 = shalt.err (!%p339_p9)
}
 0x1ed   :  { %229 = dma.vmem_to_hbm [thread:$0]  %s227_s23, 16, %s445_s5, [#allocation5]  }
 0x1ee   :  { %347 = dma.done.wait [#allocation5], 16  }
 0x1ef   :  { %348 = vsyncadd [#allocation5], 4294967280 }
 0x1f0   :  { %233 = vsyncpa [#allocation4], 1 }
 0x1f1   :  { %234 = vsyncpa [#allocation7], 1 }
 0x1f2   :  { %235 = vsyncpa [#allocation5], 1 }

</bundles_post_ra>
